<compile_context>
chip_gen: v7x
topology: tpu7x:2x2x1
jax: 0.10.0
libtpu: 0.0.40
codegen_flags: <defaults>
</compile_context>

<pallas_src>
import math

import jax
import jax.numpy as jnp
from jax.experimental import pallas as pl
from jax.experimental.pallas import tpu as pltpu

_SMALL_N = 32          # <= this -> lane-dense pairwise kernel
_BISECT_ITERS = 30     # tau interval has length 1 -> ~1e-9 tau accuracy


def _round_up(a, b):
    return ((a + b - 1) // b) * b


# ----------------------------------------------------------------------------
# Kernels
# ----------------------------------------------------------------------------
def _sparsemax_kernel_lanes(x_ref, o_ref):
    """Sparsemax along axis 0 (sublanes) of a lane-dense (N, TL) block."""
    z = x_ref[...].astype(jnp.float32)                     # (N, TL)
    n = z.shape[0]
    k = jnp.zeros_like(z)                                  # #{j : z_j >= z_i}
    s = jnp.zeros_like(z)                                  # sum_{z_j >= z_i} z_j
    # N is small (<= _SMALL_N); each step is a stride-0 sublane broadcast plus
    # a few VPU ops over the whole block.
    for j in range(n):
        zj = z[j:j + 1, :]                                 # (1, TL)
        ge = (zj >= z).astype(jnp.float32)
        k = k + ge
        s = s + zj * ge
    cond = (1.0 + k * z > s).astype(jnp.float32)           # element in support
    k_star = jnp.max(cond * k, axis=0, keepdims=True)      # support size (>= 1)
    s_star = jnp.sum(cond * z, axis=0, keepdims=True)      # sum over support
    tau = (s_star - 1.0) / k_star
    o_ref[...] = jnp.maximum(z - tau, 0.0).astype(o_ref.dtype)


def _sparsemax_kernel_rows(x_ref, o_ref):
    """Sparsemax along the last (lane) axis of a (TM, N) block, N large."""
    z = x_ref[...].astype(jnp.float32)                     # (TM, N)
    zmax = jnp.max(z, axis=-1, keepdims=True)              # (TM, 1)
    # tau* lies in [zmax - 1, zmax]; f(tau) = sum(relu(z - tau)) - 1 is
    # monotone decreasing with f(zmax - 1) >= 0 and f(zmax) = -1.
    lo = zmax - 1.0
    hi = zmax
    # Fixed, statically-unrolled bisection (trip count is tiny and static).
    for _ in range(_BISECT_ITERS):
        mid = 0.5 * (lo + hi)
        f = jnp.sum(jnp.maximum(z - mid, 0.0), axis=-1, keepdims=True)
        above = f < 1.0                                    # mid is above the root
        lo = jnp.where(above, lo, mid)
        hi = jnp.where(above, mid, hi)
    tau0 = 0.5 * (lo + hi)
    # Exact recovery: identify the support from tau0 and recompute tau so each
    # row sums to exactly 1 (up to f32 roundoff).
    sup = (z > tau0).astype(jnp.float32)
    k = jnp.sum(sup, axis=-1, keepdims=True)               # always >= 1
    s = jnp.sum(sup * z, axis=-1, keepdims=True)
    tau = (s - 1.0) / k
    o_ref[...] = jnp.maximum(z - tau, 0.0).astype(o_ref.dtype)


# ----------------------------------------------------------------------------
# Tiling choices (~512 KiB f32 blocks; fits v5e's 16 MiB scoped VMEM default
# even with double-buffered in/out plus in-kernel temporaries)
# ----------------------------------------------------------------------------
def _choose_tl(m, n):
    """Lane tile for the (N, TL) lane-dense path: multiple of 128."""
    target = (512 * 1024) // max(1, 4 * n)
    tl = max(128, min(4096, (target // 128) * 128))
    m128 = _round_up(m, 128)
    if m128 < 2 * tl:                   # keep >= 2 grid steps when possible
        tl = max(128, (m128 // 2 // 128) * 128) if m128 >= 256 else m128
    return tl


def _choose_tm(m, n):
    """Row tile for the (TM, N) path: multiple of 8."""
    target = (512 * 1024) // max(1, 4 * n)
    tm = max(8, min(1024, (target // 8) * 8))
    m8 = _round_up(m, 8)
    if m8 < 2 * tm:                     # keep >= 2 grid steps when possible
        tm = max(8, (m8 // 2 // 8) * 8) if m8 >= 16 else m8
    return tm


# ----------------------------------------------------------------------------
# Wrappers
# ----------------------------------------------------------------------------
def _sparsemax_2d_lanes(x2):
    """x2: (m, n) with small n; sparsemax along n via lane-dense layout."""
    m, n = x2.shape
    tl = _choose_tl(m, n)
    m_pad = _round_up(m, tl)
    xt = x2.T                                              # (n, m): rows -> lanes
    if m_pad != m:
        xt = jnp.pad(xt, ((0, 0), (0, m_pad - m)))         # zero cols: valid, sliced off
    out_t = pl.pallas_call(
        _sparsemax_kernel_lanes,
        out_shape=jax.ShapeDtypeStruct((n, m_pad), x2.dtype),
        grid=(m_pad // tl,),
        in_specs=[pl.BlockSpec((n, tl), lambda i: (0, i))],
        out_specs=pl.BlockSpec((n, tl), lambda i: (0, i)),
        compiler_params=pltpu.CompilerParams(dimension_semantics=("parallel",)),
    )(xt)
    return out_t[:, :m].T


def _sparsemax_2d_rows(x2):
    """x2: (m, n) with large n; sparsemax along n (lanes), bisection kernel."""
    m, n = x2.shape
    tm = _choose_tm(m, n)
    m_pad = _round_up(m, tm)
    if m_pad != m:
        x2 = jnp.pad(x2, ((0, m_pad - m), (0, 0)))         # zero rows: valid, sliced off
    out = pl.pallas_call(
        _sparsemax_kernel_rows,
        out_shape=jax.ShapeDtypeStruct((m_pad, n), x2.dtype),
        grid=(m_pad // tm,),
        in_specs=[pl.BlockSpec((tm, n), lambda i: (i, 0))],
        out_specs=pl.BlockSpec((tm, n), lambda i: (i, 0)),
        compiler_params=pltpu.CompilerParams(dimension_semantics=("parallel",)),
    )(x2)
    return out[:m]


def sparsemax(x, dim=-1):
    """Pallas sparsemax along `dim`, matching torch Sparsemax.forward."""
    nd = x.ndim
    dim = dim % nd
    # TODO(synk): for dim != -1 the moveaxis round trip costs two extra HBM
    # transposes; a strided index_map could avoid it.
    xm = jnp.moveaxis(x, dim, -1) if dim != nd - 1 else x
    lead = xm.shape[:-1]
    n = xm.shape[-1]
    m = math.prod(lead) if lead else 1
    x2 = xm.reshape(m, n)
    out2 = _sparsemax_2d_lanes(x2) if n <= _SMALL_N else _sparsemax_2d_rows(x2)
    out = out2.reshape(lead + (n,))
    return jnp.moveaxis(out, -1, dim) if dim != nd - 1 else out


# ----------------------------------------------------------------------------
# Reference + test
# ----------------------------------------------------------------------------
def _ref_sparsemax_lastdim(x):
    """Plain-JAX mirror of the torch code (sort/cumsum based), for checking."""
    z = x - jnp.max(x, axis=-1, keepdims=True)
    zs = -jnp.sort(-z, axis=-1)
    n = z.shape[-1]
    rng = jnp.arange(1, n + 1, dtype=z.dtype)
    bound = 1 + rng * zs
    cum = jnp.cumsum(zs, axis=-1)
    is_gt = (bound > cum).astype(z.dtype)
    k = jnp.max(is_gt * rng, axis=-1, keepdims=True)
    taus = (jnp.sum(is_gt * zs, axis=-1, keepdims=True) - 1.0) / k
    return jnp.maximum(z - taus, 0.0)


if __name__ == "__main__":
    # Sparsemax() has no learnable parameters — nothing to initialize.
    key = jax.random.PRNGKey(0)
    x = jax.random.normal(key, (2, 4, 16, 16), dtype=jnp.float32)   # NCHW

    y = jax.block_until_ready(sparsemax(x))                         # dim=-1 default
    y_ref = _ref_sparsemax_lastdim(x)
    assert y.shape == x.shape and y.dtype == x.dtype
    assert jnp.allclose(y, y_ref, atol=1e-5), float(jnp.max(jnp.abs(y - y_ref)))
    assert jnp.allclose(jnp.sum(y, axis=-1), 1.0, atol=1e-5)        # rows on simplex

    # Exercise the wide-reduction (bisection) path as well.
    xw = jax.random.normal(jax.random.PRNGKey(1), (2, 3, 8, 256), dtype=jnp.float32)
    yw = jax.block_until_ready(sparsemax(xw))
    yw_ref = _ref_sparsemax_lastdim(xw)
    assert jnp.allclose(yw, yw_ref, atol=1e-5), float(jnp.max(jnp.abs(yw - yw_ref)))
    assert jnp.allclose(jnp.sum(yw, axis=-1), 1.0, atol=1e-5)

    print("KERNEL_OK")
</pallas_src>

<mosaic_0001>
module attributes {stable_mosaic.version = 11 : i64} {
  func.func @_sparsemax_kernel_lanes(%arg0: i32, %arg1: memref<16x128xf32, #tpu.memory_space<vmem>>, %arg2: memref<16x128xf32, #tpu.memory_space<vmem>>) attributes {dimension_semantics = [#tpu.dimension_semantics<parallel>], iteration_bounds = array<i64: 1>, scalar_prefetch = 0 : i64, scratch_operands = 0 : i64, tpu.core_type = #tpu.core_type<tc>, window_params = [{transform_indices = @transform_0, window_bounds = array<i64: 16, 128>}, {transform_indices = @transform_1, window_bounds = array<i64: 16, 128>}]} {
    %c0 = arith.constant 0 : index
    %c0_0 = arith.constant 0 : index
    %0 = vector.load %arg1[%c0, %c0_0] : memref<16x128xf32, #tpu.memory_space<vmem>>, vector<16x128xf32>
    %cst = arith.constant 0.000000e+00 : f32
    %1 = vector.broadcast %cst : f32 to vector<16x128xf32>
    %cst_1 = arith.constant 0.000000e+00 : f32
    %2 = vector.broadcast %cst_1 : f32 to vector<16x128xf32>
    %3 = vector.extract_strided_slice %0 {offsets = [0, 0], sizes = [1, 128], strides = [1, 1]} : vector<16x128xf32> to vector<1x128xf32>
    %4 = vector.broadcast %3 : vector<1x128xf32> to vector<16x128xf32>
    %5 = arith.cmpf oge, %4, %0 : vector<16x128xf32>
    %6 = arith.extui %5 : vector<16x128xi1> to vector<16x128xi32>
    %7 = arith.sitofp %6 : vector<16x128xi32> to vector<16x128xf32>
    %8 = arith.addf %1, %7 : vector<16x128xf32>
    %9 = vector.broadcast %3 : vector<1x128xf32> to vector<16x128xf32>
    %10 = arith.mulf %9, %7 : vector<16x128xf32>
    %11 = arith.addf %2, %10 : vector<16x128xf32>
    %12 = vector.extract_strided_slice %0 {offsets = [1, 0], sizes = [1, 128], strides = [1, 1]} : vector<16x128xf32> to vector<1x128xf32>
    %13 = vector.broadcast %12 : vector<1x128xf32> to vector<16x128xf32>
    %14 = arith.cmpf oge, %13, %0 : vector<16x128xf32>
    %15 = arith.extui %14 : vector<16x128xi1> to vector<16x128xi32>
    %16 = arith.sitofp %15 : vector<16x128xi32> to vector<16x128xf32>
    %17 = arith.addf %8, %16 : vector<16x128xf32>
    %18 = vector.broadcast %12 : vector<1x128xf32> to vector<16x128xf32>
    %19 = arith.mulf %18, %16 : vector<16x128xf32>
    %20 = arith.addf %11, %19 : vector<16x128xf32>
    %21 = vector.extract_strided_slice %0 {offsets = [2, 0], sizes = [1, 128], strides = [1, 1]} : vector<16x128xf32> to vector<1x128xf32>
    %22 = vector.broadcast %21 : vector<1x128xf32> to vector<16x128xf32>
    %23 = arith.cmpf oge, %22, %0 : vector<16x128xf32>
    %24 = arith.extui %23 : vector<16x128xi1> to vector<16x128xi32>
    %25 = arith.sitofp %24 : vector<16x128xi32> to vector<16x128xf32>
    %26 = arith.addf %17, %25 : vector<16x128xf32>
    %27 = vector.broadcast %21 : vector<1x128xf32> to vector<16x128xf32>
    %28 = arith.mulf %27, %25 : vector<16x128xf32>
    %29 = arith.addf %20, %28 : vector<16x128xf32>
    %30 = vector.extract_strided_slice %0 {offsets = [3, 0], sizes = [1, 128], strides = [1, 1]} : vector<16x128xf32> to vector<1x128xf32>
    %31 = vector.broadcast %30 : vector<1x128xf32> to vector<16x128xf32>
    %32 = arith.cmpf oge, %31, %0 : vector<16x128xf32>
    %33 = arith.extui %32 : vector<16x128xi1> to vector<16x128xi32>
    %34 = arith.sitofp %33 : vector<16x128xi32> to vector<16x128xf32>
    %35 = arith.addf %26, %34 : vector<16x128xf32>
    %36 = vector.broadcast %30 : vector<1x128xf32> to vector<16x128xf32>
    %37 = arith.mulf %36, %34 : vector<16x128xf32>
    %38 = arith.addf %29, %37 : vector<16x128xf32>
    %39 = vector.extract_strided_slice %0 {offsets = [4, 0], sizes = [1, 128], strides = [1, 1]} : vector<16x128xf32> to vector<1x128xf32>
    %40 = vector.broadcast %39 : vector<1x128xf32> to vector<16x128xf32>
    %41 = arith.cmpf oge, %40, %0 : vector<16x128xf32>
    %42 = arith.extui %41 : vector<16x128xi1> to vector<16x128xi32>
    %43 = arith.sitofp %42 : vector<16x128xi32> to vector<16x128xf32>
    %44 = arith.addf %35, %43 : vector<16x128xf32>
    %45 = vector.broadcast %39 : vector<1x128xf32> to vector<16x128xf32>
    %46 = arith.mulf %45, %43 : vector<16x128xf32>
    %47 = arith.addf %38, %46 : vector<16x128xf32>
    %48 = vector.extract_strided_slice %0 {offsets = [5, 0], sizes = [1, 128], strides = [1, 1]} : vector<16x128xf32> to vector<1x128xf32>
    %49 = vector.broadcast %48 : vector<1x128xf32> to vector<16x128xf32>
    %50 = arith.cmpf oge, %49, %0 : vector<16x128xf32>
    %51 = arith.extui %50 : vector<16x128xi1> to vector<16x128xi32>
    %52 = arith.sitofp %51 : vector<16x128xi32> to vector<16x128xf32>
    %53 = arith.addf %44, %52 : vector<16x128xf32>
    %54 = vector.broadcast %48 : vector<1x128xf32> to vector<16x128xf32>
    %55 = arith.mulf %54, %52 : vector<16x128xf32>
    %56 = arith.addf %47, %55 : vector<16x128xf32>
    %57 = vector.extract_strided_slice %0 {offsets = [6, 0], sizes = [1, 128], strides = [1, 1]} : vector<16x128xf32> to vector<1x128xf32>
    %58 = vector.broadcast %57 : vector<1x128xf32> to vector<16x128xf32>
    %59 = arith.cmpf oge, %58, %0 : vector<16x128xf32>
    %60 = arith.extui %59 : vector<16x128xi1> to vector<16x128xi32>
    %61 = arith.sitofp %60 : vector<16x128xi32> to vector<16x128xf32>
    %62 = arith.addf %53, %61 : vector<16x128xf32>
    %63 = vector.broadcast %57 : vector<1x128xf32> to vector<16x128xf32>
    %64 = arith.mulf %63, %61 : vector<16x128xf32>
    %65 = arith.addf %56, %64 : vector<16x128xf32>
    %66 = vector.extract_strided_slice %0 {offsets = [7, 0], sizes = [1, 128], strides = [1, 1]} : vector<16x128xf32> to vector<1x128xf32>
    %67 = vector.broadcast %66 : vector<1x128xf32> to vector<16x128xf32>
    %68 = arith.cmpf oge, %67, %0 : vector<16x128xf32>
    %69 = arith.extui %68 : vector<16x128xi1> to vector<16x128xi32>
    %70 = arith.sitofp %69 : vector<16x128xi32> to vector<16x128xf32>
    %71 = arith.addf %62, %70 : vector<16x128xf32>
    %72 = vector.broadcast %66 : vector<1x128xf32> to vector<16x128xf32>
    %73 = arith.mulf %72, %70 : vector<16x128xf32>
    %74 = arith.addf %65, %73 : vector<16x128xf32>
    %75 = vector.extract_strided_slice %0 {offsets = [8, 0], sizes = [1, 128], strides = [1, 1]} : vector<16x128xf32> to vector<1x128xf32>
    %76 = vector.broadcast %75 : vector<1x128xf32> to vector<16x128xf32>
    %77 = arith.cmpf oge, %76, %0 : vector<16x128xf32>
    %78 = arith.extui %77 : vector<16x128xi1> to vector<16x128xi32>
    %79 = arith.sitofp %78 : vector<16x128xi32> to vector<16x128xf32>
    %80 = arith.addf %71, %79 : vector<16x128xf32>
    %81 = vector.broadcast %75 : vector<1x128xf32> to vector<16x128xf32>
    %82 = arith.mulf %81, %79 : vector<16x128xf32>
    %83 = arith.addf %74, %82 : vector<16x128xf32>
    %84 = vector.extract_strided_slice %0 {offsets = [9, 0], sizes = [1, 128], strides = [1, 1]} : vector<16x128xf32> to vector<1x128xf32>
    %85 = vector.broadcast %84 : vector<1x128xf32> to vector<16x128xf32>
    %86 = arith.cmpf oge, %85, %0 : vector<16x128xf32>
    %87 = arith.extui %86 : vector<16x128xi1> to vector<16x128xi32>
    %88 = arith.sitofp %87 : vector<16x128xi32> to vector<16x128xf32>
    %89 = arith.addf %80, %88 : vector<16x128xf32>
    %90 = vector.broadcast %84 : vector<1x128xf32> to vector<16x128xf32>
    %91 = arith.mulf %90, %88 : vector<16x128xf32>
    %92 = arith.addf %83, %91 : vector<16x128xf32>
    %93 = vector.extract_strided_slice %0 {offsets = [10, 0], sizes = [1, 128], strides = [1, 1]} : vector<16x128xf32> to vector<1x128xf32>
    %94 = vector.broadcast %93 : vector<1x128xf32> to vector<16x128xf32>
    %95 = arith.cmpf oge, %94, %0 : vector<16x128xf32>
    %96 = arith.extui %95 : vector<16x128xi1> to vector<16x128xi32>
    %97 = arith.sitofp %96 : vector<16x128xi32> to vector<16x128xf32>
    %98 = arith.addf %89, %97 : vector<16x128xf32>
    %99 = vector.broadcast %93 : vector<1x128xf32> to vector<16x128xf32>
    %100 = arith.mulf %99, %97 : vector<16x128xf32>
    %101 = arith.addf %92, %100 : vector<16x128xf32>
    %102 = vector.extract_strided_slice %0 {offsets = [11, 0], sizes = [1, 128], strides = [1, 1]} : vector<16x128xf32> to vector<1x128xf32>
    %103 = vector.broadcast %102 : vector<1x128xf32> to vector<16x128xf32>
    %104 = arith.cmpf oge, %103, %0 : vector<16x128xf32>
    %105 = arith.extui %104 : vector<16x128xi1> to vector<16x128xi32>
    %106 = arith.sitofp %105 : vector<16x128xi32> to vector<16x128xf32>
    %107 = arith.addf %98, %106 : vector<16x128xf32>
    %108 = vector.broadcast %102 : vector<1x128xf32> to vector<16x128xf32>
    %109 = arith.mulf %108, %106 : vector<16x128xf32>
    %110 = arith.addf %101, %109 : vector<16x128xf32>
    %111 = vector.extract_strided_slice %0 {offsets = [12, 0], sizes = [1, 128], strides = [1, 1]} : vector<16x128xf32> to vector<1x128xf32>
    %112 = vector.broadcast %111 : vector<1x128xf32> to vector<16x128xf32>
    %113 = arith.cmpf oge, %112, %0 : vector<16x128xf32>
    %114 = arith.extui %113 : vector<16x128xi1> to vector<16x128xi32>
    %115 = arith.sitofp %114 : vector<16x128xi32> to vector<16x128xf32>
    %116 = arith.addf %107, %115 : vector<16x128xf32>
    %117 = vector.broadcast %111 : vector<1x128xf32> to vector<16x128xf32>
    %118 = arith.mulf %117, %115 : vector<16x128xf32>
    %119 = arith.addf %110, %118 : vector<16x128xf32>
    %120 = vector.extract_strided_slice %0 {offsets = [13, 0], sizes = [1, 128], strides = [1, 1]} : vector<16x128xf32> to vector<1x128xf32>
    %121 = vector.broadcast %120 : vector<1x128xf32> to vector<16x128xf32>
    %122 = arith.cmpf oge, %121, %0 : vector<16x128xf32>
    %123 = arith.extui %122 : vector<16x128xi1> to vector<16x128xi32>
    %124 = arith.sitofp %123 : vector<16x128xi32> to vector<16x128xf32>
    %125 = arith.addf %116, %124 : vector<16x128xf32>
    %126 = vector.broadcast %120 : vector<1x128xf32> to vector<16x128xf32>
    %127 = arith.mulf %126, %124 : vector<16x128xf32>
    %128 = arith.addf %119, %127 : vector<16x128xf32>
    %129 = vector.extract_strided_slice %0 {offsets = [14, 0], sizes = [1, 128], strides = [1, 1]} : vector<16x128xf32> to vector<1x128xf32>
    %130 = vector.broadcast %129 : vector<1x128xf32> to vector<16x128xf32>
    %131 = arith.cmpf oge, %130, %0 : vector<16x128xf32>
    %132 = arith.extui %131 : vector<16x128xi1> to vector<16x128xi32>
    %133 = arith.sitofp %132 : vector<16x128xi32> to vector<16x128xf32>
    %134 = arith.addf %125, %133 : vector<16x128xf32>
    %135 = vector.broadcast %129 : vector<1x128xf32> to vector<16x128xf32>
    %136 = arith.mulf %135, %133 : vector<16x128xf32>
    %137 = arith.addf %128, %136 : vector<16x128xf32>
    %138 = vector.extract_strided_slice %0 {offsets = [15, 0], sizes = [1, 128], strides = [1, 1]} : vector<16x128xf32> to vector<1x128xf32>
    %139 = vector.broadcast %138 : vector<1x128xf32> to vector<16x128xf32>
    %140 = arith.cmpf oge, %139, %0 : vector<16x128xf32>
    %141 = arith.extui %140 : vector<16x128xi1> to vector<16x128xi32>
    %142 = arith.sitofp %141 : vector<16x128xi32> to vector<16x128xf32>
    %143 = arith.addf %134, %142 : vector<16x128xf32>
    %144 = vector.broadcast %138 : vector<1x128xf32> to vector<16x128xf32>
    %145 = arith.mulf %144, %142 : vector<16x128xf32>
    %146 = arith.addf %137, %145 : vector<16x128xf32>
    %147 = arith.mulf %143, %0 : vector<16x128xf32>
    %cst_2 = arith.constant 1.000000e+00 : f32
    %148 = vector.broadcast %cst_2 : f32 to vector<16x128xf32>
    %149 = arith.addf %148, %147 : vector<16x128xf32>
    %150 = arith.cmpf ogt, %149, %146 : vector<16x128xf32>
    %151 = arith.extui %150 : vector<16x128xi1> to vector<16x128xi32>
    %152 = arith.sitofp %151 : vector<16x128xi32> to vector<16x128xf32>
    %153 = arith.mulf %152, %143 : vector<16x128xf32>
    %cst_3 = arith.constant dense<0xFF800000> : vector<128xf32>
    %154 = vector.multi_reduction <maximumf>, %153, %cst_3 [0] : vector<16x128xf32> to vector<128xf32>
    %155 = vector.shape_cast %154 : vector<128xf32> to vector<1x128xf32>
    %156 = arith.mulf %152, %0 : vector<16x128xf32>
    %cst_4 = arith.constant dense<0.000000e+00> : vector<128xf32>
    %157 = vector.multi_reduction <add>, %156, %cst_4 [0] : vector<16x128xf32> to vector<128xf32>
    %158 = vector.shape_cast %157 : vector<128xf32> to vector<1x128xf32>
    %cst_5 = arith.constant 1.000000e+00 : f32
    %159 = vector.broadcast %cst_5 : f32 to vector<1x128xf32>
    %160 = arith.subf %158, %159 : vector<1x128xf32>
    %161 = arith.divf %160, %155 : vector<1x128xf32>
    %162 = vector.broadcast %161 : vector<1x128xf32> to vector<16x128xf32>
    %163 = arith.subf %0, %162 : vector<16x128xf32>
    %cst_6 = arith.constant 0.000000e+00 : f32
    %164 = vector.broadcast %cst_6 : f32 to vector<16x128xf32>
    %165 = arith.maximumf %163, %164 : vector<16x128xf32>
    %c0_7 = arith.constant 0 : index
    %c0_8 = arith.constant 0 : index
    %166 = vector.load %arg2[%c0_7, %c0_8] : memref<16x128xf32, #tpu.memory_space<vmem>>, vector<16x128xf32>
    tpu.vector_store %arg2[%c0_7, %c0_8], %165 {strides = array<i32>} : memref<16x128xf32, #tpu.memory_space<vmem>>, vector<16x128xf32>,
    return
  }
  func.func @transform_0(%arg0: i32) -> (i32, i32) {
    %c0_i32 = arith.constant 0 : i32
    %c0_i32_0 = arith.constant 0 : i32
    return %c0_i32, %arg0 : i32, i32
  }
  func.func @transform_1(%arg0: i32) -> (i32, i32) {
    %c0_i32 = arith.constant 0 : i32
    %c0_i32_0 = arith.constant 0 : i32
    return %c0_i32, %arg0 : i32, i32
  }
}

</mosaic_0001>

<bundles_post_ra>
// kernel: tpu_custom_call.1
= control target key start
LH: loop header
LB: loop body
LE: loop exit
PB: predicated region body
PF: predicated region fallthrough
CT: control target
= control target key end

     0   :  { %6 = vsyncpa [#allocation3], 0  ;;  %s616_s0 = inlined_call_operand.hbm [shape: f32[16,128], index: 0, kind: input, shape index: {}]   ;;  %s617_s1 = inlined_call_operand.hbm [shape: f32[16,128], index: 1, kind: output, shape index: {}]  }
   0x1   :  { %7 = vsyncpa [#allocation4], 0  ;;  %s425_s6 = smov [#allocation2]   ;;  %s377_s10 = scalar_lea.hbm %s616_s0, 256 }
   0x2   :  { %s13_s7 = sshll.u32 %s425_s6, 4  ;;  %p378_p0 = scmp.ne.s32.totalorder %s616_s0, %s377_s10  ;;  %s14_s7 = int_to_ptr.vmem [resolvable:$true] %s13_s7 }
   0x3   :  { %p381_p1 = scmp.lt.u32.totalorder %s377_s10, %s616_s0 }
   0x5   :  { %p383_p2 = pnand %p381_p1, %p378_p0 }
   0x7   :  { %386 = shalt.err (!%p383_p2)
}
   0x8   :  { %s387_s15 = scalar_lea.vmem %s14_s7, 256  ;;  %p392_p4 = scmp.lt.s32.totalorder %s14_s7, %s14_s7 }
   0x9   :  { %p388_p3 = scmp.ne.s32.totalorder %s14_s7, %s387_s15  ;;  %p393_p5 = scmp.lt.s32.totalorder %s387_s15, %s387_s15 }
   0xb   :  { %p394_p6 = por %p393_p5, %p392_p4 }
   0xd   :  { %p395_p7 = pnand %p394_p6, %p388_p3 }
   0xf   :  { %398 = shalt.err (!%p395_p7)
}
  0x10   :  { %s426_s16 = smov 128   ;;  %s427_s17 = smov 8  }
  0x11   :  { %19 = dma.hbm_to_vmem [thread:$0]  %s616_s0, 256, %s14_s7, [#allocation3], %s426_s16, %s426_s16, %s427_s17  }
  0x12   :  { %421 = dma.done.wait [#allocation3], 256  }
  0x13   :  { %422 = vsyncadd [#allocation3], 4294967040  ;;  %v25_v0 = vlaneseq  ;;  %v465_v10 = vld [vmem:[#allocation2] sm:$0xff]  ;;  %v467_v11 = vld [vmem:[#allocation2 + $0x8] sm:$0xff]  ;;  %v428_v20 = vmov 0.0   ;;  %s429_s0 = smov [#allocation5]  }
  0x14   :  { %s323_s20 = sshll.u32 %s429_s0, 4  ;;  %s324_s20 = int_to_ptr.vmem [resolvable:$true] %s323_s20 }
  0x15   :  { %v455_v1 = vshrl.u32 %v25_v0, 7  ;;  %s399_s21 = scalar_lea.vmem %s324_s20, 256  ;;  %p404_p9 = scmp.lt.s32.totalorder %s324_s20, %s324_s20 }
  0x16   :  { %p400_p8 = scmp.ne.s32.totalorder %s324_s20, %s399_s21  ;;  %p405_p10 = scmp.lt.s32.totalorder %s399_s21, %s399_s21 }
  0x17   :  { %v27_v2 = vsub.s32 0, %v455_v1  ;;  %v43_v3 = vsub.s32 1, %v455_v1  ;;  %v59_v4 = vsub.s32 2, %v455_v1  ;;  %v75_v5 = vsub.s32 3, %v455_v1 }
  0x18   :  { %v91_v6 = vsub.s32 4, %v455_v1  ;;  %v107_v7 = vsub.s32 5, %v455_v1  ;;  %v123_v8 = vsub.s32 6, %v455_v1  ;;  %v139_v9 = vsub.s32 7, %v455_v1  ;;  %p406_p11 = por %p405_p10, %p404_p9 }
  0x19   :  { %v28_v12 = vrot.slane %v465_v10, %v27_v2  ;;  %v44_v13 = vrot.slane %v465_v10, %v43_v3  ;;  %v60_v14 = vrot.slane %v465_v10, %v59_v4  ;;  %v76_v15 = vrot.slane %v465_v10, %v75_v5 }
  0x1a   :  { %v92_v16 = vrot.slane %v465_v10, %v91_v6  ;;  %v108_v17 = vrot.slane %v465_v10, %v107_v7  ;;  %v490_v18 = vrot.slane %v465_v10, %v123_v8  ;;  %v495_v19 = vrot.slane %v465_v10, %v139_v9  ;;  %p407_p12 = pnand %p406_p11, %p400_p8 }
  0x1b   :  { %vm29_vm0 = vcmp.ge.f32.partialorder %v28_v12, %v465_v10  ;;  %vm30_vm1 = vcmp.ge.f32.partialorder %v28_v12, %v467_v11  ;;  %vm45_vm2 = vcmp.ge.f32.partialorder %v44_v13, %v465_v10  ;;  %vm46_vm3 = vcmp.ge.f32.partialorder %v44_v13, %v467_v11 }
  0x1c   :  { %v335_v21 = vsel %vm29_vm0, 1.0, %v428_v20  ;;  %v336_v22 = vsel %vm30_vm1, 1.0, %v428_v20  ;;  %v337_v23 = vsel %vm45_vm2, 1.0, %v428_v20  ;;  %v338_v24 = vsel %vm46_vm3, 1.0, %v428_v20 }
  0x1d   :  { %v37_v25 = vmul.f32 %v335_v21, %v28_v12  ;;  %v38_v26 = vmul.f32 %v336_v22, %v28_v12  ;;  %v51_v27 = vadd.f32 %v337_v23, %v335_v21  ;;  %v52_v28 = vadd.f32 %v338_v24, %v336_v22 }
  0x1e   :  { %v53_v29 = vmul.f32 %v337_v23, %v44_v13  ;;  %v54_v30 = vmul.f32 %v338_v24, %v44_v13  ;;  %vm61_vm4 = vcmp.ge.f32.partialorder %v60_v14, %v465_v10  ;;  %vm62_vm5 = vcmp.ge.f32.partialorder %v60_v14, %v467_v11 }
  0x1f   :  { %v339_v31 = vsel %vm61_vm4, 1.0, %v428_v20  ;;  %v340_v32 = vsel %vm62_vm5, 1.0, %v428_v20  ;;  %vm77_vm6 = vcmp.ge.f32.partialorder %v76_v15, %v465_v10  ;;  %vm78_vm7 = vcmp.ge.f32.partialorder %v76_v15, %v467_v11 }
  0x20   :  { %v55_v33 = vadd.f32 %v53_v29, %v37_v25  ;;  %v56_v34 = vadd.f32 %v54_v30, %v38_v26  ;;  %v67_v35 = vadd.f32 %v339_v31, %v51_v27  ;;  %v68_v36 = vadd.f32 %v340_v32, %v52_v28 }
  0x21   :  { %v69_v37 = vmul.f32 %v339_v31, %v60_v14  ;;  %v70_v38 = vmul.f32 %v340_v32, %v60_v14  ;;  %v341_v39 = vsel %vm77_vm6, 1.0, %v428_v20  ;;  %v342_v40 = vsel %vm78_vm7, 1.0, %v428_v20 }
  0x22   :  { %v83_v41 = vadd.f32 %v341_v39, %v67_v35  ;;  %v84_v42 = vadd.f32 %v342_v40, %v68_v36  ;;  %v85_v43 = vmul.f32 %v341_v39, %v76_v15  ;;  %v86_v44 = vmul.f32 %v342_v40, %v76_v15 }
  0x23   :  { %v71_v45 = vadd.f32 %v69_v37, %v55_v33  ;;  %v72_v46 = vadd.f32 %v70_v38, %v56_v34  ;;  %vm93_vm8 = vcmp.ge.f32.partialorder %v92_v16, %v465_v10  ;;  %vm94_vm9 = vcmp.ge.f32.partialorder %v92_v16, %v467_v11 }
  0x24   :  { %v343_v47 = vsel %vm93_vm8, 1.0, %v428_v20  ;;  %v344_v48 = vsel %vm94_vm9, 1.0, %v428_v20  ;;  %vm109_vm10 = vcmp.ge.f32.partialorder %v108_v17, %v465_v10  ;;  %vm110_vm11 = vcmp.ge.f32.partialorder %v108_v17, %v467_v11 }
  0x25   :  { %v87_v49 = vadd.f32 %v85_v43, %v71_v45  ;;  %v88_v50 = vadd.f32 %v86_v44, %v72_v46  ;;  %v99_v51 = vadd.f32 %v343_v47, %v83_v41  ;;  %v100_v52 = vadd.f32 %v344_v48, %v84_v42 }
  0x26   :  { %v101_v53 = vmul.f32 %v343_v47, %v92_v16  ;;  %v102_v54 = vmul.f32 %v344_v48, %v92_v16  ;;  %v345_v55 = vsel %vm109_vm10, 1.0, %v428_v20  ;;  %v346_v56 = vsel %vm110_vm11, 1.0, %v428_v20 }
  0x27   :  { %v115_v57 = vadd.f32 %v345_v55, %v99_v51  ;;  %v116_v58 = vadd.f32 %v346_v56, %v100_v52  ;;  %v117_v59 = vmul.f32 %v345_v55, %v108_v17  ;;  %v118_v60 = vmul.f32 %v346_v56, %v108_v17 }
  0x28   :  { %v103_v61 = vadd.f32 %v101_v53, %v87_v49  ;;  %v104_v62 = vadd.f32 %v102_v54, %v88_v50  ;;  %vm125_vm12 = vcmp.ge.f32.partialorder %v490_v18, %v465_v10  ;;  %vm126_vm13 = vcmp.ge.f32.partialorder %v490_v18, %v467_v11 }
  0x29   :  { %v347_v63 = vsel %vm125_vm12, 1.0, %v428_v20  ;;  %v348_v0 = vsel %vm126_vm13, 1.0, %v428_v20  ;;  %vm141_vm14 = vcmp.ge.f32.partialorder %v495_v19, %v465_v10  ;;  %vm142_vm15 = vcmp.ge.f32.partialorder %v495_v19, %v467_v11 }
  0x2a   :  { %v119_v12 = vadd.f32 %v117_v59, %v103_v61  ;;  %v120_v13 = vadd.f32 %v118_v60, %v104_v62  ;;  %v131_v14 = vadd.f32 %v347_v63, %v115_v57  ;;  %v132_v15 = vadd.f32 %v348_v0, %v116_v58 }
  0x2b   :  { %v133_v16 = vmul.f32 %v347_v63, %v490_v18  ;;  %v134_v17 = vmul.f32 %v348_v0, %v490_v18  ;;  %v349_v21 = vsel %vm141_vm14, 1.0, %v428_v20  ;;  %v350_v22 = vsel %vm142_vm15, 1.0, %v428_v20 }
  0x2c   :  { %v147_v23 = vadd.f32 %v349_v21, %v131_v14  ;;  %v148_v24 = vadd.f32 %v350_v22, %v132_v15  ;;  %v149_v25 = vmul.f32 %v349_v21, %v495_v19  ;;  %v150_v26 = vmul.f32 %v350_v22, %v495_v19 }
  0x2d   :  { %v135_v27 = vadd.f32 %v133_v16, %v119_v12  ;;  %v136_v28 = vadd.f32 %v134_v17, %v120_v13  ;;  %v156_v29 = vrot.slane %v467_v11, %v27_v2  ;;  %v172_v18 = vrot.slane %v467_v11, %v43_v3 }
  0x2e   :  { %v188_v30 = vrot.slane %v467_v11, %v59_v4  ;;  %v204_v31 = vrot.slane %v467_v11, %v75_v5  ;;  %v220_v19 = vrot.slane %v467_v11, %v91_v6  ;;  %v236_v2 = vrot.slane %v467_v11, %v107_v7 }
  0x2f   :  { %v151_v32 = vadd.f32 %v149_v25, %v135_v27  ;;  %v152_v33 = vadd.f32 %v150_v26, %v136_v28  ;;  %vm157_vm0 = vcmp.ge.f32.partialorder %v156_v29, %v465_v10  ;;  %vm158_vm1 = vcmp.ge.f32.partialorder %v156_v29, %v467_v11 }
  0x30   :  { %v351_v3 = vsel %vm157_vm0, 1.0, %v428_v20  ;;  %v352_v4 = vsel %vm158_vm1, 1.0, %v428_v20  ;;  %vm173_vm2 = vcmp.ge.f32.partialorder %v172_v18, %v465_v10  ;;  %vm174_vm3 = vcmp.ge.f32.partialorder %v172_v18, %v467_v11 }
  0x31   :  { %v163_v5 = vadd.f32 %v351_v3, %v147_v23  ;;  %v164_v6 = vadd.f32 %v352_v4, %v148_v24  ;;  %v165_v34 = vmul.f32 %v351_v3, %v156_v29  ;;  %v166_v35 = vmul.f32 %v352_v4, %v156_v29 }
  0x32   :  { %v353_v7 = vsel %vm173_vm2, 1.0, %v428_v20  ;;  %v354_v36 = vsel %vm174_vm3, 1.0, %v428_v20  ;;  %vm189_vm4 = vcmp.ge.f32.partialorder %v188_v30, %v465_v10  ;;  %vm190_vm5 = vcmp.ge.f32.partialorder %v188_v30, %v467_v11 }
  0x33   :  { %v167_v37 = vadd.f32 %v165_v34, %v151_v32  ;;  %v168_v38 = vadd.f32 %v166_v35, %v152_v33  ;;  %v179_v39 = vadd.f32 %v353_v7, %v163_v5  ;;  %v180_v40 = vadd.f32 %v354_v36, %v164_v6 }
  0x34   :  { %v181_v41 = vmul.f32 %v353_v7, %v172_v18  ;;  %v182_v42 = vmul.f32 %v354_v36, %v172_v18  ;;  %v355_v43 = vsel %vm189_vm4, 1.0, %v428_v20  ;;  %v356_v44 = vsel %vm190_vm5, 1.0, %v428_v20 }
  0x35   :  { %v195_v45 = vadd.f32 %v355_v43, %v179_v39  ;;  %v196_v46 = vadd.f32 %v356_v44, %v180_v40  ;;  %v197_v47 = vmul.f32 %v355_v43, %v188_v30  ;;  %v198_v48 = vmul.f32 %v356_v44, %v188_v30 }
  0x36   :  { %v183_v49 = vadd.f32 %v181_v41, %v167_v37  ;;  %v184_v50 = vadd.f32 %v182_v42, %v168_v38  ;;  %vm205_vm6 = vcmp.ge.f32.partialorder %v204_v31, %v465_v10  ;;  %vm206_vm7 = vcmp.ge.f32.partialorder %v204_v31, %v467_v11 }
  0x37   :  { %v357_v51 = vsel %vm205_vm6, 1.0, %v428_v20  ;;  %v358_v52 = vsel %vm206_vm7, 1.0, %v428_v20  ;;  %vm221_vm8 = vcmp.ge.f32.partialorder %v220_v19, %v465_v10  ;;  %vm222_vm9 = vcmp.ge.f32.partialorder %v220_v19, %v467_v11 }
  0x38   :  { %v199_v53 = vadd.f32 %v197_v47, %v183_v49  ;;  %v200_v54 = vadd.f32 %v198_v48, %v184_v50  ;;  %v211_v55 = vadd.f32 %v357_v51, %v195_v45  ;;  %v212_v56 = vadd.f32 %v358_v52, %v196_v46 }
  0x39   :  { %v213_v57 = vmul.f32 %v357_v51, %v204_v31  ;;  %v214_v58 = vmul.f32 %v358_v52, %v204_v31  ;;  %v359_v59 = vsel %vm221_vm8, 1.0, %v428_v20  ;;  %v360_v60 = vsel %vm222_vm9, 1.0, %v428_v20 }
  0x3a   :  { %v227_v61 = vadd.f32 %v359_v59, %v211_v55  ;;  %v228_v62 = vadd.f32 %v360_v60, %v212_v56  ;;  %v229_v63 = vmul.f32 %v359_v59, %v220_v19  ;;  %v230_v0 = vmul.f32 %v360_v60, %v220_v19 }
  0x3b   :  { %v215_v12 = vadd.f32 %v213_v57, %v199_v53  ;;  %v216_v13 = vadd.f32 %v214_v58, %v200_v54  ;;  %vm237_vm10 = vcmp.ge.f32.partialorder %v236_v2, %v465_v10  ;;  %vm238_vm11 = vcmp.ge.f32.partialorder %v236_v2, %v467_v11 }
  0x3c   :  { %v361_v14 = vsel %vm237_vm10, 1.0, %v428_v20  ;;  %v362_v15 = vsel %vm238_vm11, 1.0, %v428_v20  ;;  %v252_v16 = vrot.slane %v467_v11, %v123_v8  ;;  %v268_v17 = vrot.slane %v467_v11, %v139_v9 }
  0x3d   :  { %v231_v21 = vadd.f32 %v229_v63, %v215_v12  ;;  %v232_v22 = vadd.f32 %v230_v0, %v216_v13  ;;  %v243_v23 = vadd.f32 %v361_v14, %v227_v61  ;;  %v244_v24 = vadd.f32 %v362_v15, %v228_v62 }
  0x3e   :  { %v245_v25 = vmul.f32 %v361_v14, %v236_v2  ;;  %v246_v26 = vmul.f32 %v362_v15, %v236_v2  ;;  %vm253_vm12 = vcmp.ge.f32.partialorder %v252_v16, %v465_v10  ;;  %vm254_vm13 = vcmp.ge.f32.partialorder %v252_v16, %v467_v11 }
  0x3f   :  { %v363_v27 = vsel %vm253_vm12, 1.0, %v428_v20  ;;  %v364_v28 = vsel %vm254_vm13, 1.0, %v428_v20  ;;  %vm269_vm14 = vcmp.ge.f32.partialorder %v268_v17, %v465_v10  ;;  %vm270_vm15 = vcmp.ge.f32.partialorder %v268_v17, %v467_v11 }
  0x40   :  { %v247_v1 = vadd.f32 %v245_v25, %v231_v21  ;;  %v248_v8 = vadd.f32 %v246_v26, %v232_v22  ;;  %v259_v9 = vadd.f32 %v363_v27, %v243_v23  ;;  %v260_v29 = vadd.f32 %v364_v28, %v244_v24 }
  0x41   :  { %v261_v18 = vmul.f32 %v363_v27, %v252_v16  ;;  %v262_v30 = vmul.f32 %v364_v28, %v252_v16  ;;  %v365_v31 = vsel %vm269_vm14, 1.0, %v428_v20  ;;  %v366_v19 = vsel %vm270_vm15, 1.0, %v428_v20 }
  0x42   :  { %v275_v2 = vadd.f32 %v365_v31, %v259_v9  ;;  %v276_v32 = vadd.f32 %v366_v19, %v260_v29  ;;  %v277_v33 = vmul.f32 %v365_v31, %v268_v17  ;;  %v278_v3 = vmul.f32 %v366_v19, %v268_v17 }
  0x43   :  { %v263_v4 = vadd.f32 %v261_v18, %v247_v1  ;;  %v264_v5 = vadd.f32 %v262_v30, %v248_v8 }
  0x44   :  { %v281_v6 = vmul.f32 %v275_v2, %v465_v10  ;;  %v282_v34 = vmul.f32 %v276_v32, %v467_v11 }
  0x45   :  { %v279_v35 = vadd.f32 %v277_v33, %v263_v4  ;;  %v280_v7 = vadd.f32 %v278_v3, %v264_v5 }
  0x46   :  { %v283_v36 = vadd.f32 1.0, %v281_v6  ;;  %v284_v37 = vadd.f32 1.0, %v282_v34 }
  0x48   :  { %vm285_vm0 = vcmp.gt.f32.partialorder %v283_v36, %v279_v35  ;;  %vm286_vm1 = vcmp.gt.f32.partialorder %v284_v37, %v280_v7 }
  0x49   :  { %v367_v38 = vsel %vm285_vm0, 1.0, %v428_v20  ;;  %v368_v39 = vsel %vm286_vm1, 1.0, %v428_v20 }
  0x4a   :  { %v291_v40 = vmul.f32 %v367_v38, %v275_v2  ;;  %v292_v41 = vmul.f32 %v368_v39, %v276_v32  ;;  %v300_v42 = vmul.f32 %v367_v38, %v465_v10  ;;  %v301_v43 = vmul.f32 %v368_v39, %v467_v11 }
  0x4c   :  { %v293_v44 = vmax.f32 %v291_v40, %v292_v41  ;;  %v302_v45 = vadd.f32 %v301_v43, %v300_v42 }
  0x4e   :  { %v294_v46 = vrot.slane %v293_v44, 4  ;;  %v303_v47 = vrot.slane %v302_v45, 4 }
  0x50   :  { %v295_v48 = vmax.f32 %v293_v44, %v294_v46  ;;  %v304_v49 = vadd.f32 %v303_v47, %v302_v45 }
  0x52   :  { %v296_v50 = vrot.slane %v295_v48, 2  ;;  %v305_v51 = vrot.slane %v304_v49, 2 }
  0x54   :  { %v297_v52 = vmax.f32 %v295_v48, %v296_v50  ;;  %v306_v53 = vadd.f32 %v305_v51, %v304_v49 }
  0x56   :  { %v298_v54 = vrot.slane %v297_v52, 1  ;;  %v307_v56 = vrot.slane %v306_v53, 1 }
  0x58   :  { %v299_v55 = vmax.f32 %v297_v52, %v298_v54  ;;  %v308_v20 = vadd.f32 %v307_v56, %v306_v53 }
  0x5a   :  { %375 = vrcp.f32 %v299_v55  ;;  %v369_v57 = vadd.f32 -1.0, %v308_v20 }
  0x64   :  { %v376_v58 = vpop.eup %375 }
  0x65   :  { %v311_v59 = vmul.f32 %v376_v58, %v369_v57 }
  0x67   :  { %v312_v60 = vsub.f32 %v465_v10, %v311_v59  ;;  %v313_v61 = vsub.f32 %v467_v11, %v311_v59 }
  0x69   :  { %v314_v62 = vmax.f32 %v312_v60, 0.0  ;;  %v315_v63 = vmax.f32 %v313_v61, 0.0 }
  0x6b   :  { %316 = vst [vmem:[#allocation5] sm:$0xff] %v314_v62  ;;  %317 = vst [vmem:[#allocation5 + $0x8] sm:$0xff] %v315_v63 }
  0x6c   :  { %410 = shalt.err (!%p407_p12)
}
  0x6d   :  { %s411_s24 = scalar_lea.hbm %s617_s1, 256 }
  0x6e   :  { %p412_p13 = scmp.ne.s32.totalorder %s617_s1, %s411_s24  ;;  %p415_p0 = scmp.lt.u32.totalorder %s411_s24, %s617_s1 }
  0x70   :  { %p417_p1 = pnand %p415_p0, %p412_p13 }
  0x72   :  { %420 = shalt.err (!%p417_p1)
}
  0x73   :  { %329 = dma.vmem_to_hbm [thread:$0]  %s324_s20, 256, %s617_s1, [#allocation4], %s426_s16, %s426_s16, %s427_s17  }
  0x74   :  { %423 = dma.done.wait [#allocation4], 256  }
  0x75   :  { %424 = vsyncadd [#allocation4], 4294967040 }
  0x76   :  { %333 = vsyncpa [#allocation3], 1 }
  0x77   :  { %334 = vsyncpa [#allocation4], 1 }

</bundles_post_ra>
